<compile_context>
chip_gen: v6e
topology: v6e:2x2x1
jax: 0.10.0
libtpu: 0.0.40
codegen_flags: <defaults>
</compile_context>

<pallas_src>
import functools

import jax
import jax.numpy as jnp
from jax.experimental import pallas as pl
from jax.experimental.pallas import tpu as pltpu


def _lstm_mlp_kernel(x_ref, w_slab_ref, lin_slab_ref, out_ref, *,
                     seq_len, batch, d_in, hidden):
    """Whole-sequence LSTM + Linear in one invocation.

    x_ref:        (B, S, D_in)        batch-major, untouched host layout
    w_slab_ref:   (D_in + H + 1, 4H)  rows: [W_ih^T ; W_hh^T ; b_ih + b_hh]
    lin_slab_ref: (H + 1, E)          rows: [W_lin^T ; b_lin]
    out_ref:      (B, S, E)
    Gate order along the 4H axis is PyTorch's [i, f, g, o].
    """
    S, B, H = seq_len, batch, hidden

    # ---- Unpack packed weight slab (static sublane slices of VMEM refs).
    w_ih = w_slab_ref[0:d_in, :]                  # (D_in, 4H)
    w_hh = w_slab_ref[d_in:d_in + H, :]           # (H,    4H)
    b = w_slab_ref[d_in + H:d_in + H + 1, :]      # (1,    4H) = b_ih + b_hh

    # ---- Phase 1: hoisted input projection for ALL (b, t) rows (one matmul).
    x2 = x_ref[...].reshape(B * S, d_in)          # pure sublane-tile regroup
    gx = jnp.dot(x2, w_ih, preferred_element_type=jnp.float32) + b  # (B*S,4H)
    gx = gx.reshape(B, S, 4 * H)                  # batch-major; dim 1 = sublanes

    # ---- Hoisted lane mask: g-gate lanes take tanh, the rest sigmoid.
    lane = jax.lax.broadcasted_iota(jnp.int32, (B, 4 * H), 1)
    g_lane = (lane >= 2 * H) & (lane < 3 * H)

    # ---- Phase 2: sequential recurrence, h0 = c0 = 0 (static unroll, S small).
    h = jnp.zeros((B, H), jnp.float32)
    c = jnp.zeros((B, H), jnp.float32)
    hs = []
    for t in range(S):
        gates = gx[:, t, :] + jnp.dot(h, w_hh,
                                      preferred_element_type=jnp.float32)
        # Two full-width EUP passes + one lane-masked VPU select per step,
        # then slice the *activated* result into the four gates.
        act = jnp.where(g_lane, jnp.tanh(gates), jax.nn.sigmoid(gates))
        i_g = act[:, 0 * H:1 * H]
        f_g = act[:, 1 * H:2 * H]
        g_g = act[:, 2 * H:3 * H]
        o_g = act[:, 3 * H:4 * H]
        c = f_g * c + i_g * g_g
        h = o_g * jnp.tanh(c)
        hs.append(h)

    # ---- Phase 3: deferred Linear over all timesteps + ONE output store.
    hs_bm = jnp.stack(hs, axis=1).reshape(B * S, H)   # row index = b*S + t
    w_lin = lin_slab_ref[0:H, :]                      # (H, E)
    b_lin = lin_slab_ref[H:H + 1, :]                  # (1, E)
    out = jnp.dot(hs_bm, w_lin, preferred_element_type=jnp.float32) + b_lin
    out_ref[...] = out.reshape(B, S, out.shape[-1]).astype(out_ref.dtype)


def exercise_encoder_mlp(x, params):
    """x: (B, S, input_dim*2). Returns (B, S, num_exercise)."""
    w_slab, lin_slab = params
    B, S, D_in = x.shape
    H4 = w_slab.shape[1]
    H = H4 // 4
    E = lin_slab.shape[1]

    kernel = functools.partial(_lstm_mlp_kernel,
                               seq_len=S, batch=B, d_in=D_in, hidden=H)

    return pl.pallas_call(
        kernel,
        out_shape=jax.ShapeDtypeStruct((B, S, E), jnp.float32),
        grid_spec=pltpu.PrefetchScalarGridSpec(
            num_scalar_prefetch=0,
            grid=(1,),                                        # single invocation
            in_specs=[
                pl.BlockSpec((B, S, D_in), lambda i: (0, 0, 0)),       # x
                pl.BlockSpec((D_in + H + 1, 4 * H), lambda i: (0, 0)),  # LSTM slab
                pl.BlockSpec((H + 1, E), lambda i: (0, 0)),             # Linear slab
            ],
            out_specs=pl.BlockSpec((B, S, E), lambda i: (0, 0, 0)),
        ),
        compiler_params=pltpu.CompilerParams(
            dimension_semantics=("arbitrary",),
        ),
    )(x.astype(jnp.float32), w_slab, lin_slab)


def init_params(key, input_dim, hidden_size, num_exercise):
    """Deterministic synthetic parameters, packed into two DMA-friendly slabs."""
    D_in = input_dim * 2
    H = hidden_size
    k = 1.0 / jnp.sqrt(jnp.float32(H))
    ks = jax.random.split(key, 6)
    # Stored pre-transposed for the y = x @ W^T convention used in the kernel.
    w_ih = jax.random.uniform(ks[0], (D_in, 4 * H), jnp.float32, -k, k)
    w_hh = jax.random.uniform(ks[1], (H, 4 * H), jnp.float32, -k, k)
    b_ih = jax.random.uniform(ks[2], (1, 4 * H), jnp.float32, -k, k)
    b_hh = jax.random.uniform(ks[3], (1, 4 * H), jnp.float32, -k, k)
    w_lin = jax.random.uniform(ks[4], (H, num_exercise), jnp.float32, -k, k)
    b_lin = jax.random.uniform(ks[5], (1, num_exercise), jnp.float32, -k, k)
    # Pack: fewer pallas_call operands -> fewer prologue DMA descriptors.
    w_slab = jnp.concatenate([w_ih, w_hh, b_ih + b_hh], axis=0)  # (D_in+H+1, 4H)
    lin_slab = jnp.concatenate([w_lin, b_lin], axis=0)           # (H+1, E)
    return (w_slab, lin_slab)


def reference_forward(x, params):
    """Pure-JAX reference mirroring nn.LSTM (gate order i,f,g,o) + Linear."""
    w_slab, lin_slab = params
    H4 = w_slab.shape[1]
    H = H4 // 4
    D_in = w_slab.shape[0] - H - 1
    w_ih = w_slab[:D_in]
    w_hh = w_slab[D_in:D_in + H]
    b = w_slab[D_in + H:D_in + H + 1]
    w_lin = lin_slab[:H]
    b_lin = lin_slab[H:H + 1]

    B = x.shape[0]

    def step(carry, x_t):
        h, c = carry
        gates = x_t @ w_ih + h @ w_hh + b
        i_g = jax.nn.sigmoid(gates[:, 0 * H:1 * H])
        f_g = jax.nn.sigmoid(gates[:, 1 * H:2 * H])
        g_g = jnp.tanh(gates[:, 2 * H:3 * H])
        o_g = jax.nn.sigmoid(gates[:, 3 * H:4 * H])
        c_new = f_g * c + i_g * g_g
        h_new = o_g * jnp.tanh(c_new)
        return (h_new, c_new), h_new

    h0 = jnp.zeros((B, H), jnp.float32)
    c0 = jnp.zeros((B, H), jnp.float32)
    _, hs = jax.lax.scan(step, (h0, c0), jnp.transpose(x, (1, 0, 2)))
    out = jnp.transpose(hs, (1, 0, 2)) @ w_lin + b_lin
    return out


if __name__ == "__main__":
    # Small shapes consistent with the module's forward:
    # input_dim=4 -> feature dim = input_dim*2 = 8, hidden=32, num_exercise=16
    batch, seq, input_dim, hidden, num_exercise = 2, 8, 4, 32, 16

    key = jax.random.PRNGKey(0)
    kx, kp = jax.random.split(key)
    x = jax.random.normal(kx, (batch, seq, input_dim * 2), jnp.float32)
    params = init_params(kp, input_dim, hidden, num_exercise)

    fwd = jax.jit(exercise_encoder_mlp)
    out = jax.block_until_ready(fwd(x, params))

    ref = reference_forward(x, params)
    assert out.shape == (batch, seq, num_exercise)
    assert jnp.allclose(out, ref, rtol=1e-3, atol=1e-3), \
        f"max abs err {jnp.max(jnp.abs(out - ref))}"

    print("KERNEL_OK")
</pallas_src>

<mosaic_0001>
module attributes {stable_mosaic.version = 11 : i64} {
  func.func @_lstm_mlp_kernel(%arg0: i32, %arg1: memref<2x8x8xf32, #tpu.memory_space<vmem>>, %arg2: memref<41x128xf32, #tpu.memory_space<vmem>>, %arg3: memref<33x16xf32, #tpu.memory_space<vmem>>, %arg4: memref<2x8x16xf32, #tpu.memory_space<vmem>>) attributes {dimension_semantics = [#tpu.dimension_semantics<arbitrary>], iteration_bounds = array<i64: 1>, scalar_prefetch = 0 : i64, scratch_operands = 0 : i64, tpu.core_type = #tpu.core_type<tc>, window_params = [{pipeline_mode = #tpu.pipeline_mode<synchronous>, transform_indices = @transform_0, window_bounds = array<i64: 2, 8, 8>}, {pipeline_mode = #tpu.pipeline_mode<synchronous>, transform_indices = @transform_1, window_bounds = array<i64: 41, 128>}, {pipeline_mode = #tpu.pipeline_mode<synchronous>, transform_indices = @transform_2, window_bounds = array<i64: 33, 16>}, {pipeline_mode = #tpu.pipeline_mode<synchronous>, transform_indices = @transform_3, window_bounds = array<i64: 2, 8, 16>}]} {
    %c0 = arith.constant 0 : index
    %c0_0 = arith.constant 0 : index
    %0 = vector.load %arg2[%c0, %c0_0] : memref<41x128xf32, #tpu.memory_space<vmem>>, vector<8x128xf32>
    %c8 = arith.constant 8 : index
    %c0_1 = arith.constant 0 : index
    %1 = vector.load %arg2[%c8, %c0_1] : memref<41x128xf32, #tpu.memory_space<vmem>>, vector<32x128xf32>
    %c40 = arith.constant 40 : index
    %c0_2 = arith.constant 0 : index
    %2 = vector.load %arg2[%c40, %c0_2] : memref<41x128xf32, #tpu.memory_space<vmem>>, vector<1x128xf32>
    %c0_3 = arith.constant 0 : index
    %c0_4 = arith.constant 0 : index
    %c0_5 = arith.constant 0 : index
    %3 = vector.load %arg1[%c0_3, %c0_4, %c0_5] : memref<2x8x8xf32, #tpu.memory_space<vmem>>, vector<2x8x8xf32>
    %4 = vector.shape_cast %3 : vector<2x8x8xf32> to vector<16x8xf32>
    %cst = arith.constant dense<0.000000e+00> : vector<16x128xf32>
    %5 = tpu.matmul %4, %0, %cst {dimension_numbers = #tpu.dot_dimension_numbers<[1], [0], [0], [1], [0, 0, 1, 1], [], []>} : vector<16x8xf32>, vector<8x128xf32>, vector<16x128xf32> -> vector<16x128xf32>
    %6 = vector.broadcast %2 : vector<1x128xf32> to vector<16x128xf32>
    %7 = arith.addf %5, %6 : vector<16x128xf32>
    %8 = vector.shape_cast %7 : vector<16x128xf32> to vector<2x8x128xf32>
    %9 = tpu.iota {dimensions = array<i32: 1>} : vector<2x128xi32>
    %c64_i32 = arith.constant 64 : i32
    %10 = vector.broadcast %c64_i32 : i32 to vector<2x128xi32>
    %11 = arith.cmpi sge, %9, %10 : vector<2x128xi32>
    %c96_i32 = arith.constant 96 : i32
    %12 = vector.broadcast %c96_i32 : i32 to vector<2x128xi32>
    %13 = arith.cmpi slt, %9, %12 : vector<2x128xi32>
    %14 = arith.andi %11, %13 : vector<2x128xi1>
    %cst_6 = arith.constant 0.000000e+00 : f32
    %15 = vector.broadcast %cst_6 : f32 to vector<2x32xf32>
    %cst_7 = arith.constant 0.000000e+00 : f32
    %16 = vector.broadcast %cst_7 : f32 to vector<2x32xf32>
    %17 = vector.extract_strided_slice %8 {offsets = [0, 0, 0], sizes = [2, 1, 128], strides = [1, 1, 1]} : vector<2x8x128xf32> to vector<2x1x128xf32>
    %18 = vector.shape_cast %17 : vector<2x1x128xf32> to vector<2x128xf32>
    %cst_8 = arith.constant dense<0.000000e+00> : vector<2x128xf32>
    %19 = tpu.matmul %15, %1, %cst_8 {dimension_numbers = #tpu.dot_dimension_numbers<[1], [0], [0], [1], [0, 0, 1, 1], [], []>} : vector<2x32xf32>, vector<32x128xf32>, vector<2x128xf32> -> vector<2x128xf32>
    %20 = arith.addf %18, %19 : vector<2x128xf32>
    %21 = math.tanh %20 : vector<2x128xf32>
    %22 = arith.negf %20 : vector<2x128xf32>
    %23 = math.exp %22 : vector<2x128xf32>
    %cst_9 = arith.constant 1.000000e+00 : f32
    %24 = vector.broadcast %cst_9 : f32 to vector<2x128xf32>
    %25 = arith.addf %24, %23 : vector<2x128xf32>
    %26 = arith.divf %24, %25 : vector<2x128xf32>
    %27 = arith.select %14, %21, %26 : vector<2x128xi1>, vector<2x128xf32>
    %28 = vector.extract_strided_slice %27 {offsets = [0, 0], sizes = [2, 32], strides = [1, 1]} : vector<2x128xf32> to vector<2x32xf32>
    %29 = vector.extract_strided_slice %27 {offsets = [0, 32], sizes = [2, 32], strides = [1, 1]} : vector<2x128xf32> to vector<2x32xf32>
    %30 = vector.extract_strided_slice %27 {offsets = [0, 64], sizes = [2, 32], strides = [1, 1]} : vector<2x128xf32> to vector<2x32xf32>
    %31 = vector.extract_strided_slice %27 {offsets = [0, 96], sizes = [2, 32], strides = [1, 1]} : vector<2x128xf32> to vector<2x32xf32>
    %32 = arith.mulf %29, %16 : vector<2x32xf32>
    %33 = arith.mulf %28, %30 : vector<2x32xf32>
    %34 = arith.addf %32, %33 : vector<2x32xf32>
    %35 = math.tanh %34 : vector<2x32xf32>
    %36 = arith.mulf %31, %35 : vector<2x32xf32>
    %37 = vector.extract_strided_slice %8 {offsets = [0, 1, 0], sizes = [2, 1, 128], strides = [1, 1, 1]} : vector<2x8x128xf32> to vector<2x1x128xf32>
    %38 = vector.shape_cast %37 : vector<2x1x128xf32> to vector<2x128xf32>
    %cst_10 = arith.constant dense<0.000000e+00> : vector<2x128xf32>
    %39 = tpu.matmul %36, %1, %cst_10 {dimension_numbers = #tpu.dot_dimension_numbers<[1], [0], [0], [1], [0, 0, 1, 1], [], []>} : vector<2x32xf32>, vector<32x128xf32>, vector<2x128xf32> -> vector<2x128xf32>
    %40 = arith.addf %38, %39 : vector<2x128xf32>
    %41 = math.tanh %40 : vector<2x128xf32>
    %42 = arith.negf %40 : vector<2x128xf32>
    %43 = math.exp %42 : vector<2x128xf32>
    %cst_11 = arith.constant 1.000000e+00 : f32
    %44 = vector.broadcast %cst_11 : f32 to vector<2x128xf32>
    %45 = arith.addf %44, %43 : vector<2x128xf32>
    %46 = arith.divf %44, %45 : vector<2x128xf32>
    %47 = arith.select %14, %41, %46 : vector<2x128xi1>, vector<2x128xf32>
    %48 = vector.extract_strided_slice %47 {offsets = [0, 0], sizes = [2, 32], strides = [1, 1]} : vector<2x128xf32> to vector<2x32xf32>
    %49 = vector.extract_strided_slice %47 {offsets = [0, 32], sizes = [2, 32], strides = [1, 1]} : vector<2x128xf32> to vector<2x32xf32>
    %50 = vector.extract_strided_slice %47 {offsets = [0, 64], sizes = [2, 32], strides = [1, 1]} : vector<2x128xf32> to vector<2x32xf32>
    %51 = vector.extract_strided_slice %47 {offsets = [0, 96], sizes = [2, 32], strides = [1, 1]} : vector<2x128xf32> to vector<2x32xf32>
    %52 = arith.mulf %49, %34 : vector<2x32xf32>
    %53 = arith.mulf %48, %50 : vector<2x32xf32>
    %54 = arith.addf %52, %53 : vector<2x32xf32>
    %55 = math.tanh %54 : vector<2x32xf32>
    %56 = arith.mulf %51, %55 : vector<2x32xf32>
    %57 = vector.extract_strided_slice %8 {offsets = [0, 2, 0], sizes = [2, 1, 128], strides = [1, 1, 1]} : vector<2x8x128xf32> to vector<2x1x128xf32>
    %58 = vector.shape_cast %57 : vector<2x1x128xf32> to vector<2x128xf32>
    %cst_12 = arith.constant dense<0.000000e+00> : vector<2x128xf32>
    %59 = tpu.matmul %56, %1, %cst_12 {dimension_numbers = #tpu.dot_dimension_numbers<[1], [0], [0], [1], [0, 0, 1, 1], [], []>} : vector<2x32xf32>, vector<32x128xf32>, vector<2x128xf32> -> vector<2x128xf32>
    %60 = arith.addf %58, %59 : vector<2x128xf32>
    %61 = math.tanh %60 : vector<2x128xf32>
    %62 = arith.negf %60 : vector<2x128xf32>
    %63 = math.exp %62 : vector<2x128xf32>
    %cst_13 = arith.constant 1.000000e+00 : f32
    %64 = vector.broadcast %cst_13 : f32 to vector<2x128xf32>
    %65 = arith.addf %64, %63 : vector<2x128xf32>
    %66 = arith.divf %64, %65 : vector<2x128xf32>
    %67 = arith.select %14, %61, %66 : vector<2x128xi1>, vector<2x128xf32>
    %68 = vector.extract_strided_slice %67 {offsets = [0, 0], sizes = [2, 32], strides = [1, 1]} : vector<2x128xf32> to vector<2x32xf32>
    %69 = vector.extract_strided_slice %67 {offsets = [0, 32], sizes = [2, 32], strides = [1, 1]} : vector<2x128xf32> to vector<2x32xf32>
    %70 = vector.extract_strided_slice %67 {offsets = [0, 64], sizes = [2, 32], strides = [1, 1]} : vector<2x128xf32> to vector<2x32xf32>
    %71 = vector.extract_strided_slice %67 {offsets = [0, 96], sizes = [2, 32], strides = [1, 1]} : vector<2x128xf32> to vector<2x32xf32>
    %72 = arith.mulf %69, %54 : vector<2x32xf32>
    %73 = arith.mulf %68, %70 : vector<2x32xf32>
    %74 = arith.addf %72, %73 : vector<2x32xf32>
    %75 = math.tanh %74 : vector<2x32xf32>
    %76 = arith.mulf %71, %75 : vector<2x32xf32>
    %77 = vector.extract_strided_slice %8 {offsets = [0, 3, 0], sizes = [2, 1, 128], strides = [1, 1, 1]} : vector<2x8x128xf32> to vector<2x1x128xf32>
    %78 = vector.shape_cast %77 : vector<2x1x128xf32> to vector<2x128xf32>
    %cst_14 = arith.constant dense<0.000000e+00> : vector<2x128xf32>
    %79 = tpu.matmul %76, %1, %cst_14 {dimension_numbers = #tpu.dot_dimension_numbers<[1], [0], [0], [1], [0, 0, 1, 1], [], []>} : vector<2x32xf32>, vector<32x128xf32>, vector<2x128xf32> -> vector<2x128xf32>
    %80 = arith.addf %78, %79 : vector<2x128xf32>
    %81 = math.tanh %80 : vector<2x128xf32>
    %82 = arith.negf %80 : vector<2x128xf32>
    %83 = math.exp %82 : vector<2x128xf32>
    %cst_15 = arith.constant 1.000000e+00 : f32
    %84 = vector.broadcast %cst_15 : f32 to vector<2x128xf32>
    %85 = arith.addf %84, %83 : vector<2x128xf32>
    %86 = arith.divf %84, %85 : vector<2x128xf32>
    %87 = arith.select %14, %81, %86 : vector<2x128xi1>, vector<2x128xf32>
    %88 = vector.extract_strided_slice %87 {offsets = [0, 0], sizes = [2, 32], strides = [1, 1]} : vector<2x128xf32> to vector<2x32xf32>
    %89 = vector.extract_strided_slice %87 {offsets = [0, 32], sizes = [2, 32], strides = [1, 1]} : vector<2x128xf32> to vector<2x32xf32>
    %90 = vector.extract_strided_slice %87 {offsets = [0, 64], sizes = [2, 32], strides = [1, 1]} : vector<2x128xf32> to vector<2x32xf32>
    %91 = vector.extract_strided_slice %87 {offsets = [0, 96], sizes = [2, 32], strides = [1, 1]} : vector<2x128xf32> to vector<2x32xf32>
    %92 = arith.mulf %89, %74 : vector<2x32xf32>
    %93 = arith.mulf %88, %90 : vector<2x32xf32>
    %94 = arith.addf %92, %93 : vector<2x32xf32>
    %95 = math.tanh %94 : vector<2x32xf32>
    %96 = arith.mulf %91, %95 : vector<2x32xf32>
    %97 = vector.extract_strided_slice %8 {offsets = [0, 4, 0], sizes = [2, 1, 128], strides = [1, 1, 1]} : vector<2x8x128xf32> to vector<2x1x128xf32>
    %98 = vector.shape_cast %97 : vector<2x1x128xf32> to vector<2x128xf32>
    %cst_16 = arith.constant dense<0.000000e+00> : vector<2x128xf32>
    %99 = tpu.matmul %96, %1, %cst_16 {dimension_numbers = #tpu.dot_dimension_numbers<[1], [0], [0], [1], [0, 0, 1, 1], [], []>} : vector<2x32xf32>, vector<32x128xf32>, vector<2x128xf32> -> vector<2x128xf32>
    %100 = arith.addf %98, %99 : vector<2x128xf32>
    %101 = math.tanh %100 : vector<2x128xf32>
    %102 = arith.negf %100 : vector<2x128xf32>
    %103 = math.exp %102 : vector<2x128xf32>
    %cst_17 = arith.constant 1.000000e+00 : f32
    %104 = vector.broadcast %cst_17 : f32 to vector<2x128xf32>
    %105 = arith.addf %104, %103 : vector<2x128xf32>
    %106 = arith.divf %104, %105 : vector<2x128xf32>
    %107 = arith.select %14, %101, %106 : vector<2x128xi1>, vector<2x128xf32>
    %108 = vector.extract_strided_slice %107 {offsets = [0, 0], sizes = [2, 32], strides = [1, 1]} : vector<2x128xf32> to vector<2x32xf32>
    %109 = vector.extract_strided_slice %107 {offsets = [0, 32], sizes = [2, 32], strides = [1, 1]} : vector<2x128xf32> to vector<2x32xf32>
    %110 = vector.extract_strided_slice %107 {offsets = [0, 64], sizes = [2, 32], strides = [1, 1]} : vector<2x128xf32> to vector<2x32xf32>
    %111 = vector.extract_strided_slice %107 {offsets = [0, 96], sizes = [2, 32], strides = [1, 1]} : vector<2x128xf32> to vector<2x32xf32>
    %112 = arith.mulf %109, %94 : vector<2x32xf32>
    %113 = arith.mulf %108, %110 : vector<2x32xf32>
    %114 = arith.addf %112, %113 : vector<2x32xf32>
    %115 = math.tanh %114 : vector<2x32xf32>
    %116 = arith.mulf %111, %115 : vector<2x32xf32>
    %117 = vector.extract_strided_slice %8 {offsets = [0, 5, 0], sizes = [2, 1, 128], strides = [1, 1, 1]} : vector<2x8x128xf32> to vector<2x1x128xf32>
    %118 = vector.shape_cast %117 : vector<2x1x128xf32> to vector<2x128xf32>
    %cst_18 = arith.constant dense<0.000000e+00> : vector<2x128xf32>
    %119 = tpu.matmul %116, %1, %cst_18 {dimension_numbers = #tpu.dot_dimension_numbers<[1], [0], [0], [1], [0, 0, 1, 1], [], []>} : vector<2x32xf32>, vector<32x128xf32>, vector<2x128xf32> -> vector<2x128xf32>
    %120 = arith.addf %118, %119 : vector<2x128xf32>
    %121 = math.tanh %120 : vector<2x128xf32>
    %122 = arith.negf %120 : vector<2x128xf32>
    %123 = math.exp %122 : vector<2x128xf32>
    %cst_19 = arith.constant 1.000000e+00 : f32
    %124 = vector.broadcast %cst_19 : f32 to vector<2x128xf32>
    %125 = arith.addf %124, %123 : vector<2x128xf32>
    %126 = arith.divf %124, %125 : vector<2x128xf32>
    %127 = arith.select %14, %121, %126 : vector<2x128xi1>, vector<2x128xf32>
    %128 = vector.extract_strided_slice %127 {offsets = [0, 0], sizes = [2, 32], strides = [1, 1]} : vector<2x128xf32> to vector<2x32xf32>
    %129 = vector.extract_strided_slice %127 {offsets = [0, 32], sizes = [2, 32], strides = [1, 1]} : vector<2x128xf32> to vector<2x32xf32>
    %130 = vector.extract_strided_slice %127 {offsets = [0, 64], sizes = [2, 32], strides = [1, 1]} : vector<2x128xf32> to vector<2x32xf32>
    %131 = vector.extract_strided_slice %127 {offsets = [0, 96], sizes = [2, 32], strides = [1, 1]} : vector<2x128xf32> to vector<2x32xf32>
    %132 = arith.mulf %129, %114 : vector<2x32xf32>
    %133 = arith.mulf %128, %130 : vector<2x32xf32>
    %134 = arith.addf %132, %133 : vector<2x32xf32>
    %135 = math.tanh %134 : vector<2x32xf32>
    %136 = arith.mulf %131, %135 : vector<2x32xf32>
    %137 = vector.extract_strided_slice %8 {offsets = [0, 6, 0], sizes = [2, 1, 128], strides = [1, 1, 1]} : vector<2x8x128xf32> to vector<2x1x128xf32>
    %138 = vector.shape_cast %137 : vector<2x1x128xf32> to vector<2x128xf32>
    %cst_20 = arith.constant dense<0.000000e+00> : vector<2x128xf32>
    %139 = tpu.matmul %136, %1, %cst_20 {dimension_numbers = #tpu.dot_dimension_numbers<[1], [0], [0], [1], [0, 0, 1, 1], [], []>} : vector<2x32xf32>, vector<32x128xf32>, vector<2x128xf32> -> vector<2x128xf32>
    %140 = arith.addf %138, %139 : vector<2x128xf32>
    %141 = math.tanh %140 : vector<2x128xf32>
    %142 = arith.negf %140 : vector<2x128xf32>
    %143 = math.exp %142 : vector<2x128xf32>
    %cst_21 = arith.constant 1.000000e+00 : f32
    %144 = vector.broadcast %cst_21 : f32 to vector<2x128xf32>
    %145 = arith.addf %144, %143 : vector<2x128xf32>
    %146 = arith.divf %144, %145 : vector<2x128xf32>
    %147 = arith.select %14, %141, %146 : vector<2x128xi1>, vector<2x128xf32>
    %148 = vector.extract_strided_slice %147 {offsets = [0, 0], sizes = [2, 32], strides = [1, 1]} : vector<2x128xf32> to vector<2x32xf32>
    %149 = vector.extract_strided_slice %147 {offsets = [0, 32], sizes = [2, 32], strides = [1, 1]} : vector<2x128xf32> to vector<2x32xf32>
    %150 = vector.extract_strided_slice %147 {offsets = [0, 64], sizes = [2, 32], strides = [1, 1]} : vector<2x128xf32> to vector<2x32xf32>
    %151 = vector.extract_strided_slice %147 {offsets = [0, 96], sizes = [2, 32], strides = [1, 1]} : vector<2x128xf32> to vector<2x32xf32>
    %152 = arith.mulf %149, %134 : vector<2x32xf32>
    %153 = arith.mulf %148, %150 : vector<2x32xf32>
    %154 = arith.addf %152, %153 : vector<2x32xf32>
    %155 = math.tanh %154 : vector<2x32xf32>
    %156 = arith.mulf %151, %155 : vector<2x32xf32>
    %157 = vector.extract_strided_slice %8 {offsets = [0, 7, 0], sizes = [2, 1, 128], strides = [1, 1, 1]} : vector<2x8x128xf32> to vector<2x1x128xf32>
    %158 = vector.shape_cast %157 : vector<2x1x128xf32> to vector<2x128xf32>
    %cst_22 = arith.constant dense<0.000000e+00> : vector<2x128xf32>
    %159 = tpu.matmul %156, %1, %cst_22 {dimension_numbers = #tpu.dot_dimension_numbers<[1], [0], [0], [1], [0, 0, 1, 1], [], []>} : vector<2x32xf32>, vector<32x128xf32>, vector<2x128xf32> -> vector<2x128xf32>
    %160 = arith.addf %158, %159 : vector<2x128xf32>
    %161 = math.tanh %160 : vector<2x128xf32>
    %162 = arith.negf %160 : vector<2x128xf32>
    %163 = math.exp %162 : vector<2x128xf32>
    %cst_23 = arith.constant 1.000000e+00 : f32
    %164 = vector.broadcast %cst_23 : f32 to vector<2x128xf32>
    %165 = arith.addf %164, %163 : vector<2x128xf32>
    %166 = arith.divf %164, %165 : vector<2x128xf32>
    %167 = arith.select %14, %161, %166 : vector<2x128xi1>, vector<2x128xf32>
    %168 = vector.extract_strided_slice %167 {offsets = [0, 0], sizes = [2, 32], strides = [1, 1]} : vector<2x128xf32> to vector<2x32xf32>
    %169 = vector.extract_strided_slice %167 {offsets = [0, 32], sizes = [2, 32], strides = [1, 1]} : vector<2x128xf32> to vector<2x32xf32>
    %170 = vector.extract_strided_slice %167 {offsets = [0, 64], sizes = [2, 32], strides = [1, 1]} : vector<2x128xf32> to vector<2x32xf32>
    %171 = vector.extract_strided_slice %167 {offsets = [0, 96], sizes = [2, 32], strides = [1, 1]} : vector<2x128xf32> to vector<2x32xf32>
    %172 = arith.mulf %169, %154 : vector<2x32xf32>
    %173 = arith.mulf %168, %170 : vector<2x32xf32>
    %174 = arith.addf %172, %173 : vector<2x32xf32>
    %175 = math.tanh %174 : vector<2x32xf32>
    %176 = arith.mulf %171, %175 : vector<2x32xf32>
    %177 = vector.shape_cast %36 : vector<2x32xf32> to vector<2x1x32xf32>
    %178 = vector.shape_cast %56 : vector<2x32xf32> to vector<2x1x32xf32>
    %179 = vector.shape_cast %76 : vector<2x32xf32> to vector<2x1x32xf32>
    %180 = vector.shape_cast %96 : vector<2x32xf32> to vector<2x1x32xf32>
    %181 = vector.shape_cast %116 : vector<2x32xf32> to vector<2x1x32xf32>
    %182 = vector.shape_cast %136 : vector<2x32xf32> to vector<2x1x32xf32>
    %183 = vector.shape_cast %156 : vector<2x32xf32> to vector<2x1x32xf32>
    %184 = vector.shape_cast %176 : vector<2x32xf32> to vector<2x1x32xf32>
    %185 = tpu.concatenate %177, %178, %179, %180, %181, %182, %183, %184 in 1 : vector<2x1x32xf32>, vector<2x1x32xf32>, vector<2x1x32xf32>, vector<2x1x32xf32>, vector<2x1x32xf32>, vector<2x1x32xf32>, vector<2x1x32xf32>, vector<2x1x32xf32> -> vector<2x8x32xf32>
    %186 = vector.shape_cast %185 : vector<2x8x32xf32> to vector<16x32xf32>
    %c0_24 = arith.constant 0 : index
    %c0_25 = arith.constant 0 : index
    %187 = vector.load %arg3[%c0_24, %c0_25] : memref<33x16xf32, #tpu.memory_space<vmem>>, vector<32x16xf32>
    %c32 = arith.constant 32 : index
    %c0_26 = arith.constant 0 : index
    %188 = vector.load %arg3[%c32, %c0_26] : memref<33x16xf32, #tpu.memory_space<vmem>>, vector<1x16xf32>
    %cst_27 = arith.constant dense<0.000000e+00> : vector<16x16xf32>
    %189 = tpu.matmul %186, %187, %cst_27 {dimension_numbers = #tpu.dot_dimension_numbers<[1], [0], [0], [1], [0, 0, 1, 1], [], []>} : vector<16x32xf32>, vector<32x16xf32>, vector<16x16xf32> -> vector<16x16xf32>
    %190 = vector.broadcast %188 : vector<1x16xf32> to vector<16x16xf32>
    %191 = arith.addf %189, %190 : vector<16x16xf32>
    %192 = vector.shape_cast %191 : vector<16x16xf32> to vector<2x8x16xf32>
    %c0_28 = arith.constant 0 : index
    %c0_29 = arith.constant 0 : index
    %c0_30 = arith.constant 0 : index
    %193 = vector.load %arg4[%c0_28, %c0_29, %c0_30] : memref<2x8x16xf32, #tpu.memory_space<vmem>>, vector<2x8x16xf32>
    tpu.vector_store %arg4[%c0_28, %c0_29, %c0_30], %192 {strides = array<i32>} : memref<2x8x16xf32, #tpu.memory_space<vmem>>, vector<2x8x16xf32>,
    return
  }
  func.func @transform_0(%arg0: i32) -> (i32, i32, i32) {
    %c0_i32 = arith.constant 0 : i32
    %c0_i32_0 = arith.constant 0 : i32
    %c0_i32_1 = arith.constant 0 : i32
    %c0_i32_2 = arith.constant 0 : i32
    return %c0_i32, %c0_i32_0, %c0_i32_1 : i32, i32, i32
  }
  func.func @transform_1(%arg0: i32) -> (i32, i32) {
    %c0_i32 = arith.constant 0 : i32
    %c0_i32_0 = arith.constant 0 : i32
    %c0_i32_1 = arith.constant 0 : i32
    return %c0_i32, %c0_i32_0 : i32, i32
  }
  func.func @transform_2(%arg0: i32) -> (i32, i32) {
    %c0_i32 = arith.constant 0 : i32
    %c0_i32_0 = arith.constant 0 : i32
    %c0_i32_1 = arith.constant 0 : i32
    return %c0_i32, %c0_i32_0 : i32, i32
  }
  func.func @transform_3(%arg0: i32) -> (i32, i32, i32) {
    %c0_i32 = arith.constant 0 : i32
    %c0_i32_0 = arith.constant 0 : i32
    %c0_i32_1 = arith.constant 0 : i32
    %c0_i32_2 = arith.constant 0 : i32
    return %c0_i32, %c0_i32_0, %c0_i32_1 : i32, i32, i32
  }
}

</mosaic_0001>

<bundles_post_ra>
// kernel: exercise_encoder_mlp.1
= control target key start
LH: loop header
LB: loop body
LE: loop exit
PB: predicated region body
PF: predicated region fallthrough
CT: control target
= control target key end

     0   :  { %8 = vsyncpa [#allocation3], 0  ;;  %s2187_s0 = inlined_call_operand.hbm [shape: f32[2,8,8], index: 0, kind: input, shape index: {}]   ;;  %s2188_s1 = inlined_call_operand.vmem [shape: f32[41,128], index: 1, kind: input, shape index: {}]   ;;  %s2189_s2 = inlined_call_operand.vmem [shape: f32[33,16], index: 2, kind: input, shape index: {}]   ;;  %s2190_s3 = inlined_call_operand.hbm [shape: f32[2,8,16], index: 3, kind: output, shape index: {}]  }
   0x1   :  { %9 = vsyncpa [#allocation4], 0  ;;  %s1861_s12 = smov [#allocation2]  }
   0x2   :  { %s15_s13 = sshll.u32 %s1861_s12, 4  ;;  %s16_s13 = int_to_ptr.vmem [resolvable:$true] %s15_s13 }
   0x3   :  { %s1825_s14 = scalar_lea.vmem %s16_s13, 256  ;;  %p1830_p1 = scmp.lt.s32.totalorder %s16_s13, %s16_s13 }
   0x4   :  { %p1826_p0 = scmp.ne.s32.totalorder %s16_s13, %s1825_s14  ;;  %p1831_p2 = scmp.lt.s32.totalorder %s1825_s14, %s1825_s14 }
   0x6   :  { %p1832_p3 = por %p1831_p2, %p1830_p1 }
   0x8   :  { %p1833_p4 = pnand %p1832_p3, %p1826_p0 }
   0xa   :  { %1836 = shalt.err (!%p1833_p4)
}
   0xb   :  { %s1862_s15 = smov 128   ;;  %s1863_s16 = smov 8  }
   0xc   :  { %21 = dma.hbm_to_vmem [thread:$0]  %s2187_s0, 256, %s16_s13, [#allocation3], %s1862_s15, %s1862_s15, %s1863_s16  }
   0xd   :  { %1857 = dma.done.wait [#allocation3], 256  }
   0xe   :  { %1858 = vsyncadd [#allocation3], 4294967040  ;;  %v1864_v0 = vmov 0.0   ;;  %vm1865_vm0 = vmmov 0   ;;  %v1902_v1 = vld [vmem:[%s2188_s1 + $0x20] sm:$0xff]  ;;  %vm41_vm1 = vcmask 64512   ;;  %v123_v24 = vlaneseq }
   0xf   :  { %1597 = vmatprep.subr.mxu1 %v1864_v0  ;;  %1605 = vmatprep.mubr.msk.f32.mxu1 %vm1865_vm0, %v1864_v0  ;;  %v29_v2 = vld [vmem:[%s2188_s1] sm:$0xff]  ;;  %v1911_v4 = vld [vmem:[%s2188_s1 + $0x18] sm:$0xff]  ;;  %v36_v5 = vld [vmem:[#allocation2 + $0x8] sm:$0xff]  ;;  %vm225_vm4 = vcmask 1041409   ;;  %s1867_s30 = smov 32   ;;  %vm128_vm6 = vcmask 261120  }
  0x10   :  { %v35_v3 = vld [vmem:[#allocation2] sm:$0xff]  ;;  %1598 = vmatpush3.msra.mxu1 %v1902_v1  ;;  %1592 = vmatprep.subr.mxu0 %v29_v2  ;;  %v1917_v6 = vld [vmem:[%s2188_s1 + $0x10] sm:$0xff]  ;;  %v1924_v7 = vld [vmem:[%s2188_s1 + $0x8] sm:$0xff]  ;;  %v124_v25 = vand.u32 127, %v123_v24  ;;  %v1868_v42 = vmov 1966171168  }
  0x11   :  { %1599 = vmatprep.subr.mxu1 %v1864_v0  ;;  %1593 = vmatpush3.msra.mxu0 %v29_v2  ;;  %v1514_v9 = vld [vmem:[%s2188_s1 + $0x28] ss:$0 sm:$0xff]  ;;  %s1866_s1 = smov 64   ;;  %v1131_v43 = vunpack.c.l.s4 %v1868_v42  ;;  %v1134_v45 = vshrl.u32 %v123_v24, 7  ;;  %vm1379_vm7 = vcmask 1040384   ;;  %vm1382_vm8 = vcmask 1041408  }
  0x12   :  { %1594 = vmatprep.mubr.msk.f32.mxu0 %vm41_vm1, %v35_v3  ;;  %1600 = vmatpush3.msra.mxu1 %v1911_v4  ;;  %vm125_vm2 = vcmp.ge.s32.totalorder %v124_v25, 64  ;;  %vm126_vm3 = vcmp.lt.s32.totalorder %v124_v25, 96  ;;  %vm1385_vm9 = vcmask 1042432   ;;  %vm1388_vm10 = vcmask 1043456   ;;  %s1869_s14 = smov [#allocation5]  }
  0x13   :  { %1595 = vmatmul.mubr.msk.f32.vlgmr.msra.gmra.mxu0 %vm41_vm1, %v36_v5  ;;  %1601 = vmatprep.subr.mxu1 %v1864_v0  ;;  %vm1961_vm5 = vmand %vm125_vm2, %vm126_vm3  ;;  %v1132_v44 = vunpack.c.0.s8 %v1131_v43  ;;  %v2003_v25 = vsub.s32 0, %v1134_v45  ;;  %vm1391_vm11 = vcmask 1044480   ;;  %vm1394_vm12 = vcmask 1045504   ;;  %s1502_s17 = sshll.u32 %s1869_s14, 4  ;;  %s1503_s17 = int_to_ptr.vmem [resolvable:$true] %s1502_s17 }
  0x14   :  { %1602 = vmatpush3.msra.mxu1 %v1917_v6  ;;  %1608 = vmatprep.subr.mxu0 %v1864_v0  ;;  %vm1397_vm13 = vcmask 1046528   ;;  %vm1494_vm14 = vcmask 130048   ;;  %s1837_s18 = scalar_lea.vmem %s1503_s17, 256  ;;  %p1842_p6 = scmp.lt.s32.totalorder %s1503_s17, %s1503_s17 }
  0x15   :  { %1603 = vmatprep.subr.mxu1 %v1864_v0  ;;  %1609 = vmatpush3.msra.mxu0 %v1902_v1  ;;  %v1972_v46 = vsub.s32 %v1132_v44, %v1134_v45  ;;  %p1838_p5 = scmp.ne.s32.totalorder %s1503_s17, %s1837_s18  ;;  %p1843_p7 = scmp.lt.s32.totalorder %s1837_s18, %s1837_s18 }
  0x16   :  { %1604 = vmatpush3.msra.mxu1 %v1924_v7  ;;  %1610 = vmatprep.subr.mxu0 %v1864_v0 }
  0x17   :  { %1606 = vmatmul.mubr.f32.vlgmr.msra.gmra.mxu1 %v1864_v0  ;;  %1611 = vmatpush3.msra.mxu0 %v1911_v4  ;;  %p1844_p8 = por %p1843_p7, %p1842_p6 }
  0x18   :  { %1612 = vmatprep.subr.mxu0 %v1864_v0  ;;  %1616 = vmatprep.mubr.msk.f32.mxu0 %vm1865_vm0, %v1864_v0 }
  0x19   :  { %1613 = vmatpush3.msra.mxu0 %v1917_v6  ;;  %1619 = vmatprep.subr.mxu1 %v1864_v0  ;;  %p1845_p9 = pnand %p1844_p8, %p1838_p5 }
  0x1a   :  { %1614 = vmatprep.subr.mxu0 %v1864_v0  ;;  %1620 = vmatpush3.msra.mxu1 %v1902_v1 }
  0x1b   :  { %1615 = vmatpush3.msra.mxu0 %v1924_v7  ;;  %1621 = vmatprep.subr.mxu1 %v1864_v0 }
  0x1c   :  { %1622 = vmatpush3.msra.mxu1 %v1911_v4  ;;  %1627 = vmatprep.mubr.msk.f32.mxu1 %vm1865_vm0, %v1864_v0 }
  0x1d   :  { %1623 = vmatprep.subr.mxu1 %v1864_v0  ;;  %1630 = vmatprep.subr.mxu0 %v1864_v0 }
  0x1e   :  { %1624 = vmatpush3.msra.mxu1 %v1917_v6 }
  0x1f   :  { %1625 = vmatprep.subr.mxu1 %v1864_v0 }
  0x20   :  { %1626 = vmatpush3.msra.mxu1 %v1924_v7 }
  0x21   :  { %1641 = vmatprep.subr.mxu1 %v1864_v0 }
  0xd3   :  { %v1596_v8 = vpop.f32.mrf.mxu0 }
  0xd4   :  { %v1955_v11 = vadd.f32 %v1596_v8, %v1514_v9 }
  0xd5   :  { %v114_v10 = vpop.f32.mrf.mxu0 }
  0xd6   :  { %v1957_v12 = vadd.f32 %v1514_v9, %v114_v10 }
  0xd7   :  { %v198_v13 = vpop.f32.mrf.mxu1 }
  0xd8   :  { %v203_v14 = vrot.slane %v198_v13, 1  ;;  %v206_v15 = vadd.f32 %v198_v13, %v1957_v12 }
  0xd9   :  { %v1607_v16 = vpop.f32.mrf.mxu1 }
  0xda   :  { %v207_v17 = vadd.f32 %v203_v14, %v1955_v11  ;;  %v1517_v18 = vmul.f32 -1.442695, %v206_v15 }
  0xdc   :  { %v1518_v19 = vmul.f32 -1.442695, %v207_v17  ;;  %1705 = vpow2.f32 %v1517_v18 }
  0xde   :  { %1707 = vpow2.f32 %v1518_v19 }
  0xdf   :  { %1709 = vtanh.f32 %v207_v17 }
  0xe9   :  { %v1706_v20 = vpop.eup %1705 }
  0xea   :  { %v216_v22 = vadd.f32 1.0, %v1706_v20 }
  0xeb   :  { %v1708_v21 = vpop.eup %1707 }
  0xec   :  { %v217_v23 = vadd.f32 1.0, %v1708_v21  ;;  %v1710_v26 = vpop.eup %1709 }
  0xed   :  { %v224_v27 = vrot.slane %v1710_v26, 7 }
  0xee   :  { %1711 = vrcp.f32 %v217_v23 }
  0xef   :  { %1713 = vtanh.f32 %v206_v15 }
  0xf0   :  { %1715 = vrcp.f32 %v216_v22 }
  0xfb   :  { %v1712_v28 = vpop.eup %1711 }
  0xfc   :  { %v1714_v29 = vpop.eup %1713  ;;  %v230_v31 = vrot.slane %v1712_v28, 7 }
  0xfd   :  { %v1716_v32 = vpop.eup %1715  ;;  %v226_v33 = vsel %vm225_vm4, %v224_v27, %v1714_v29 }
  0xfe   :  { %v231_v34 = vsel %vm225_vm4, %v230_v31, %v1716_v32 }
  0xff   :  { %v233_v35 = vsel %vm1961_vm5, %v226_v33, %v231_v34 }
 0x100   :  { %236 = vrot.lane.b32.xlu0 %v233_v35, %s1866_s1  ;;  %v234_v38 = vmul.f32 0.0, %v233_v35 }
 0x172   :  { %v237_v36 = vpop.permute.xlu0 %236 }
 0x173   :  { %v239_v37 = vmul.f32 %v237_v36, %v233_v35 }
 0x175   :  { %241 = vrot.lane.b32.xlu0 %v239_v37, %s1867_s30 }
 0x1e7   :  { %v242_v39 = vpop.permute.xlu0 %241 }
 0x1e8   :  { %v244_v40 = vadd.f32 %v242_v39, %v234_v38 }
 0x1ea   :  { %1717 = vtanh.f32 %v244_v40 }
 0x1f7   :  { %v1718_v41 = vpop.eup %1717 }
 0x1f8   :  { %247 = vrot.lane.b32.xlu1 %v1718_v41, %s1866_s1 }
 0x26a   :  { %v248_v47 = vpop.permute.xlu1 %247 }
 0x26b   :  { %v250_v48 = vmul.f32 %v248_v47, %v233_v35 }
 0x26d   :  { %v1975_v49 = vrot.slane %v250_v48, %v1972_v46  ;;  %252 = vrot.lane.b32.xlu1 %v250_v48, %s1867_s30 }
 0x26f   :  { %v1137_v50 = vcombine.high %v1975_v49, %v1975_v49  ;;  %v1144_v51 = vrot.slane %v1975_v49, %v1972_v46 }
 0x271   :  { %v1151_v52 = vrot.slane %v1137_v50, %v1972_v46 }
 0x2df   :  { %v253_v53 = vpop.permute.xlu1 %252 }
 0x2e0   :  { %1617 = vmatmul.mubr.msk.f32.vlgmr.msra.gmra.mxu0 %vm128_vm6, %v253_v53 }
 0x2e1   :  { %1631 = vmatpush3.msra.mxu0 %v1902_v1  ;;  %1638 = vmatprep.mubr.msk.f32.mxu0 %vm1865_vm0, %v1864_v0 }
 0x2e2   :  { %1632 = vmatprep.subr.mxu0 %v1864_v0 }
 0x2e3   :  { %1633 = vmatpush3.msra.mxu0 %v1911_v4 }
 0x2e4   :  { %1634 = vmatprep.subr.mxu0 %v1864_v0 }
 0x2e5   :  { %1635 = vmatpush3.msra.mxu0 %v1917_v6 }
 0x2e6   :  { %1636 = vmatprep.subr.mxu0 %v1864_v0 }
 0x2e7   :  { %1637 = vmatpush3.msra.mxu0 %v1924_v7 }
 0x2e8   :  { %1652 = vmatprep.subr.mxu0 %v1864_v0 }
 0x3a0   :  { %v322_v54 = vpop.f32.mrf.mxu0 }
 0x3a1   :  { %v327_v55 = vrot.slane %v322_v54, 7  ;;  %v331_v56 = vadd.f32 %v322_v54, %v1955_v11 }
 0x3a2   :  { %v1618_v57 = vpop.f32.mrf.mxu0 }
 0x3a3   :  { %v330_v58 = vadd.f32 %v327_v55, %v1957_v12  ;;  %v1521_v59 = vmul.f32 -1.442695, %v331_v56 }
 0x3a5   :  { %v1520_v60 = vmul.f32 -1.442695, %v330_v58  ;;  %1719 = vpow2.f32 %v1521_v59 }
 0x3a7   :  { %1721 = vpow2.f32 %v1520_v60 }
 0x3a8   :  { %1723 = vtanh.f32 %v330_v58 }
 0x3b2   :  { %v1720_v61 = vpop.eup %1719 }
 0x3b3   :  { %v341_v2 = vadd.f32 1.0, %v1720_v61 }
 0x3b4   :  { %v1722_v62 = vpop.eup %1721 }
 0x3b5   :  { %v340_v63 = vadd.f32 1.0, %v1722_v62  ;;  %v1724_v3 = vpop.eup %1723 }
 0x3b6   :  { %v348_v5 = vrot.slane %v1724_v3, 1 }
 0x3b7   :  { %1725 = vrcp.f32 %v340_v63 }
 0x3b8   :  { %1727 = vtanh.f32 %v331_v56 }
 0x3b9   :  { %1729 = vrcp.f32 %v341_v2 }
 0x3c4   :  { %v1726_v8 = vpop.eup %1725 }
 0x3c5   :  { %v1728_v9 = vpop.eup %1727  ;;  %v353_v10 = vrot.slane %v1726_v8, 1 }
 0x3c6   :  { %v1730_v13 = vpop.eup %1729  ;;  %v349_v14 = vsel %vm225_vm4, %v1728_v9, %v348_v5 }
 0x3c7   :  { %v354_v15 = vsel %vm225_vm4, %v1730_v13, %v353_v10 }
 0x3c8   :  { %v356_v16 = vsel %vm1961_vm5, %v349_v14, %v354_v15 }
 0x3c9   :  { %359 = vrot.lane.b32.xlu0 %v356_v16, %s1866_s1  ;;  %v357_v19 = vmul.f32 %v356_v16, %v244_v40 }
 0x43b   :  { %v360_v17 = vpop.permute.xlu0 %359 }
 0x43c   :  { %v362_v18 = vmul.f32 %v360_v17, %v356_v16 }
 0x43e   :  { %364 = vrot.lane.b32.xlu1 %v362_v18, %s1867_s30 }
 0x4b0   :  { %v365_v20 = vpop.permute.xlu1 %364 }
 0x4b1   :  { %v367_v21 = vadd.f32 %v365_v20, %v357_v19 }
 0x4b3   :  { %1731 = vtanh.f32 %v367_v21 }
 0x4c0   :  { %v1732_v22 = vpop.eup %1731 }
 0x4c1   :  { %370 = vrot.lane.b32.xlu0 %v1732_v22, %s1866_s1 }
 0x533   :  { %v371_v23 = vpop.permute.xlu0 %370 }
 0x534   :  { %v373_v24 = vmul.f32 %v371_v23, %v356_v16 }
 0x536   :  { %v1160_v26 = vrot.slane %v373_v24, %v1972_v46  ;;  %375 = vrot.lane.b32.xlu1 %v373_v24, %s1867_s30 }
 0x538   :  { %v1161_v27 = vcombine.high %v1160_v26, %v1160_v26  ;;  %v1168_v28 = vrot.slane %v1160_v26, %v1972_v46 }
 0x53a   :  { %v1175_v29 = vrot.slane %v1161_v27, %v1972_v46  ;;  %v1312_v31 = vrot.slane %v1168_v28, %v2003_v25 }
 0x53c   :  { %v1316_v32 = vrot.slane %v1175_v29, %v2003_v25  ;;  %v2011_v33 = vsel %vm1379_vm7, %v1144_v51, %v1312_v31 }
 0x53e   :  { %v2013_v34 = vsel %vm1379_vm7, %v1151_v52, %v1316_v32 }
 0x5a8   :  { %v376_v35 = vpop.permute.xlu1 %375 }
 0x5a9   :  { %1628 = vmatmul.mubr.msk.f32.vlgmr.msra.gmra.mxu1 %vm128_vm6, %v376_v35 }
 0x5aa   :  { %1642 = vmatpush3.msra.mxu1 %v1902_v1  ;;  %1649 = vmatprep.mubr.msk.f32.mxu1 %vm1865_vm0, %v1864_v0 }
 0x5ab   :  { %1643 = vmatprep.subr.mxu1 %v1864_v0 }
 0x5ac   :  { %1644 = vmatpush3.msra.mxu1 %v1911_v4 }
 0x5ad   :  { %1645 = vmatprep.subr.mxu1 %v1864_v0 }
 0x5ae   :  { %1646 = vmatpush3.msra.mxu1 %v1917_v6 }
 0x5af   :  { %1647 = vmatprep.subr.mxu1 %v1864_v0 }
 0x5b0   :  { %1648 = vmatpush3.msra.mxu1 %v1924_v7 }
 0x5b1   :  { %1663 = vmatprep.subr.mxu1 %v1864_v0 }
 0x669   :  { %v445_v36 = vpop.f32.mrf.mxu1 }
 0x66a   :  { %v450_v37 = vrot.slane %v445_v36, 6  ;;  %v451_v38 = vrot.slane %v445_v36, 7 }
 0x66b   :  { %v1629_v39 = vpop.f32.mrf.mxu1 }
 0x66c   :  { %v454_v40 = vadd.f32 %v450_v37, %v1957_v12  ;;  %v455_v41 = vadd.f32 %v451_v38, %v1955_v11 }
 0x66e   :  { %v1523_v42 = vmul.f32 -1.442695, %v454_v40  ;;  %v1524_v43 = vmul.f32 -1.442695, %v455_v41 }
 0x670   :  { %1733 = vpow2.f32 %v1523_v42 }
 0x671   :  { %1735 = vpow2.f32 %v1524_v43 }
 0x672   :  { %1737 = vtanh.f32 %v454_v40 }
 0x673   :  { %1739 = vtanh.f32 %v455_v41 }
 0x67d   :  { %v1734_v44 = vpop.eup %1733 }
 0x67e   :  { %v1736_v45 = vpop.eup %1735  ;;  %v464_v47 = vadd.f32 1.0, %v1734_v44 }
 0x67f   :  { %v465_v48 = vadd.f32 1.0, %v1736_v45  ;;  %v1738_v49 = vpop.eup %1737 }
 0x680   :  { %1741 = vrcp.f32 %v464_v47  ;;  %v1740_v50 = vpop.eup %1739  ;;  %v472_v52 = vrot.slane %v1738_v49, 2 }
 0x681   :  { %1743 = vrcp.f32 %v465_v48  ;;  %v473_v53 = vrot.slane %v1740_v50, 1 }
 0x683   :  { %v474_v57 = vsel %vm225_vm4, %v473_v53, %v472_v52 }
 0x68d   :  { %v1742_v51 = vpop.eup %1741 }
 0x68e   :  { %v1744_v54 = vpop.eup %1743  ;;  %v478_v55 = vrot.slane %v1742_v51, 2 }
 0x68f   :  { %v479_v56 = vrot.slane %v1744_v54, 1 }
 0x691   :  { %v480_v58 = vsel %vm225_vm4, %v479_v56, %v478_v55 }
 0x692   :  { %v482_v59 = vsel %vm1961_vm5, %v474_v57, %v480_v58 }
 0x693   :  { %485 = vrot.lane.b32.xlu0 %v482_v59, %s1866_s1  ;;  %v483_v62 = vmul.f32 %v482_v59, %v367_v21 }
 0x705   :  { %v486_v60 = vpop.permute.xlu0 %485 }
 0x706   :  { %v488_v61 = vmul.f32 %v486_v60, %v482_v59 }
 0x708   :  { %490 = vrot.lane.b32.xlu1 %v488_v61, %s1867_s30 }
 0x77a   :  { %v491_v63 = vpop.permute.xlu1 %490 }
 0x77b   :  { %v493_v2 = vadd.f32 %v491_v63, %v483_v62 }
 0x77d   :  { %1745 = vtanh.f32 %v493_v2 }
 0x78a   :  { %v1746_v3 = vpop.eup %1745 }
 0x78b   :  { %496 = vrot.lane.b32.xlu0 %v1746_v3, %s1866_s1 }
 0x7fd   :  { %v497_v5 = vpop.permute.xlu0 %496 }
 0x7fe   :  { %v499_v8 = vmul.f32 %v497_v5, %v482_v59 }
 0x800   :  { %v1182_v9 = vrot.slane %v499_v8, %v1972_v46  ;;  %501 = vrot.lane.b32.xlu1 %v499_v8, %s1867_s30 }
 0x802   :  { %v1183_v10 = vcombine.high %v1182_v9, %v1182_v9  ;;  %v1190_v13 = vrot.slane %v1182_v9, %v1972_v46 }
 0x804   :  { %v1197_v14 = vrot.slane %v1183_v10, %v1972_v46  ;;  %v1322_v15 = vrot.slane %v1190_v13, %v2003_v25 }
 0x806   :  { %v1326_v16 = vrot.slane %v1197_v14, %v2003_v25  ;;  %v2042_v17 = vsel %vm1382_vm8, %v2011_v33, %v1322_v15 }
 0x808   :  { %v2045_v18 = vsel %vm1382_vm8, %v2013_v34, %v1326_v16 }
 0x872   :  { %v502_v19 = vpop.permute.xlu1 %501 }
 0x873   :  { %1639 = vmatmul.mubr.msk.f32.vlgmr.msra.gmra.mxu0 %vm128_vm6, %v502_v19 }
 0x874   :  { %1653 = vmatpush3.msra.mxu0 %v1902_v1  ;;  %1660 = vmatprep.mubr.msk.f32.mxu0 %vm1865_vm0, %v1864_v0 }
 0x875   :  { %1654 = vmatprep.subr.mxu0 %v1864_v0 }
 0x876   :  { %1655 = vmatpush3.msra.mxu0 %v1911_v4 }
 0x877   :  { %1656 = vmatprep.subr.mxu0 %v1864_v0 }
 0x878   :  { %1657 = vmatpush3.msra.mxu0 %v1917_v6 }
 0x879   :  { %1658 = vmatprep.subr.mxu0 %v1864_v0 }
 0x87a   :  { %1659 = vmatpush3.msra.mxu0 %v1924_v7 }
 0x87b   :  { %1674 = vmatprep.subr.mxu0 %v1864_v0 }
 0x933   :  { %v571_v20 = vpop.f32.mrf.mxu0 }
 0x934   :  { %v576_v21 = vrot.slane %v571_v20, 5  ;;  %v577_v22 = vrot.slane %v571_v20, 6 }
 0x935   :  { %v1640_v23 = vpop.f32.mrf.mxu0 }
 0x936   :  { %v580_v24 = vadd.f32 %v576_v21, %v1957_v12  ;;  %v581_v26 = vadd.f32 %v577_v22, %v1955_v11 }
 0x938   :  { %v1526_v27 = vmul.f32 -1.442695, %v580_v24  ;;  %v1527_v28 = vmul.f32 -1.442695, %v581_v26 }
 0x93a   :  { %1747 = vpow2.f32 %v1526_v27 }
 0x93b   :  { %1749 = vpow2.f32 %v1527_v28 }
 0x93c   :  { %1751 = vtanh.f32 %v580_v24 }
 0x93d   :  { %1753 = vtanh.f32 %v581_v26 }
 0x947   :  { %v1748_v29 = vpop.eup %1747 }
 0x948   :  { %v1750_v31 = vpop.eup %1749  ;;  %v590_v32 = vadd.f32 1.0, %v1748_v29 }
 0x949   :  { %v591_v33 = vadd.f32 1.0, %v1750_v31  ;;  %v1752_v34 = vpop.eup %1751 }
 0x94a   :  { %1755 = vrcp.f32 %v590_v32  ;;  %v1754_v35 = vpop.eup %1753  ;;  %v598_v37 = vrot.slane %v1752_v34, 3 }
 0x94b   :  { %1757 = vrcp.f32 %v591_v33  ;;  %v599_v38 = vrot.slane %v1754_v35, 2 }
 0x94d   :  { %v600_v42 = vsel %vm225_vm4, %v599_v38, %v598_v37 }
 0x957   :  { %v1756_v36 = vpop.eup %1755 }
 0x958   :  { %v1758_v39 = vpop.eup %1757  ;;  %v604_v40 = vrot.slane %v1756_v36, 3 }
 0x959   :  { %v605_v41 = vrot.slane %v1758_v39, 2 }
 0x95b   :  { %v606_v43 = vsel %vm225_vm4, %v605_v41, %v604_v40 }
 0x95c   :  { %v608_v44 = vsel %vm1961_vm5, %v600_v42, %v606_v43 }
 0x95d   :  { %611 = vrot.lane.b32.xlu0 %v608_v44, %s1866_s1  ;;  %v609_v48 = vmul.f32 %v608_v44, %v493_v2 }
 0x9cf   :  { %v612_v45 = vpop.permute.xlu0 %611 }
 0x9d0   :  { %v614_v47 = vmul.f32 %v612_v45, %v608_v44 }
 0x9d2   :  { %616 = vrot.lane.b32.xlu1 %v614_v47, %s1867_s30 }
 0xa44   :  { %v617_v49 = vpop.permute.xlu1 %616 }
 0xa45   :  { %v619_v50 = vadd.f32 %v617_v49, %v609_v48 }
 0xa47   :  { %1759 = vtanh.f32 %v619_v50 }
 0xa54   :  { %v1760_v51 = vpop.eup %1759 }
 0xa55   :  { %622 = vrot.lane.b32.xlu0 %v1760_v51, %s1866_s1 }
 0xac7   :  { %v623_v52 = vpop.permute.xlu0 %622 }
 0xac8   :  { %v625_v53 = vmul.f32 %v623_v52, %v608_v44 }
 0xaca   :  { %v1204_v54 = vrot.slane %v625_v53, %v1972_v46  ;;  %627 = vrot.lane.b32.xlu1 %v625_v53, %s1867_s30 }
 0xacc   :  { %v1205_v55 = vcombine.high %v1204_v54, %v1204_v54  ;;  %v1212_v56 = vrot.slane %v1204_v54, %v1972_v46 }
 0xace   :  { %v1219_v57 = vrot.slane %v1205_v55, %v1972_v46  ;;  %v1332_v58 = vrot.slane %v1212_v56, %v2003_v25 }
 0xad0   :  { %v1336_v59 = vrot.slane %v1219_v57, %v2003_v25  ;;  %v1386_v60 = vsel %vm1385_vm9, %v2042_v17, %v1332_v58 }
 0xad2   :  { %v1387_v61 = vsel %vm1385_vm9, %v2045_v18, %v1336_v59 }
 0xb3c   :  { %v628_v62 = vpop.permute.xlu1 %627 }
 0xb3d   :  { %1650 = vmatmul.mubr.msk.f32.vlgmr.msra.gmra.mxu1 %vm128_vm6, %v628_v62 }
 0xb3e   :  { %1664 = vmatpush3.msra.mxu1 %v1902_v1  ;;  %1671 = vmatprep.mubr.msk.f32.mxu1 %vm1865_vm0, %v1864_v0 }
 0xb3f   :  { %1665 = vmatprep.subr.mxu1 %v1864_v0 }
 0xb40   :  { %1666 = vmatpush3.msra.mxu1 %v1911_v4 }
 0xb41   :  { %1667 = vmatprep.subr.mxu1 %v1864_v0 }
 0xb42   :  { %1668 = vmatpush3.msra.mxu1 %v1917_v6 }
 0xb43   :  { %1669 = vmatprep.subr.mxu1 %v1864_v0 }
 0xb44   :  { %1670 = vmatpush3.msra.mxu1 %v1924_v7 }
 0xbfd   :  { %v697_v63 = vpop.f32.mrf.mxu1 }
 0xbfe   :  { %v702_v2 = vrot.slane %v697_v63, 4  ;;  %v703_v3 = vrot.slane %v697_v63, 5 }
 0xbff   :  { %v1651_v5 = vpop.f32.mrf.mxu1 }
 0xc00   :  { %v706_v8 = vadd.f32 %v702_v2, %v1957_v12  ;;  %v707_v9 = vadd.f32 %v703_v3, %v1955_v11 }
 0xc02   :  { %v1529_v10 = vmul.f32 -1.442695, %v706_v8  ;;  %v1530_v13 = vmul.f32 -1.442695, %v707_v9 }
 0xc04   :  { %1761 = vpow2.f32 %v1529_v10 }
 0xc05   :  { %1763 = vpow2.f32 %v1530_v13 }
 0xc06   :  { %1765 = vtanh.f32 %v706_v8 }
 0xc07   :  { %1767 = vtanh.f32 %v707_v9 }
 0xc11   :  { %v1762_v14 = vpop.eup %1761 }
 0xc12   :  { %v1764_v15 = vpop.eup %1763  ;;  %v716_v16 = vadd.f32 1.0, %v1762_v14 }
 0xc13   :  { %v717_v17 = vadd.f32 1.0, %v1764_v15  ;;  %v1766_v18 = vpop.eup %1765 }
 0xc14   :  { %1769 = vrcp.f32 %v716_v16  ;;  %v1768_v19 = vpop.eup %1767  ;;  %v724_v21 = vrot.slane %v1766_v18, 4 }
 0xc15   :  { %1771 = vrcp.f32 %v717_v17  ;;  %v725_v22 = vrot.slane %v1768_v19, 3 }
 0xc17   :  { %v726_v27 = vsel %vm225_vm4, %v725_v22, %v724_v21 }
 0xc21   :  { %v1770_v20 = vpop.eup %1769 }
 0xc22   :  { %v1772_v23 = vpop.eup %1771  ;;  %v730_v24 = vrot.slane %v1770_v20, 4 }
 0xc23   :  { %v731_v26 = vrot.slane %v1772_v23, 3 }
 0xc25   :  { %v732_v28 = vsel %vm225_vm4, %v731_v26, %v730_v24 }
 0xc26   :  { %v734_v29 = vsel %vm1961_vm5, %v726_v27, %v732_v28 }
 0xc27   :  { %737 = vrot.lane.b32.xlu0 %v734_v29, %s1866_s1  ;;  %v735_v33 = vmul.f32 %v734_v29, %v619_v50 }
 0xc99   :  { %v738_v31 = vpop.permute.xlu0 %737 }
 0xc9a   :  { %v740_v32 = vmul.f32 %v738_v31, %v734_v29 }
 0xc9c   :  { %742 = vrot.lane.b32.xlu1 %v740_v32, %s1867_s30 }
 0xd0e   :  { %v743_v34 = vpop.permute.xlu1 %742 }
 0xd0f   :  { %v745_v35 = vadd.f32 %v743_v34, %v735_v33 }
 0xd11   :  { %1773 = vtanh.f32 %v745_v35 }
 0xd1e   :  { %v1774_v36 = vpop.eup %1773 }
 0xd1f   :  { %748 = vrot.lane.b32.xlu0 %v1774_v36, %s1866_s1 }
 0xd91   :  { %v749_v37 = vpop.permute.xlu0 %748 }
 0xd92   :  { %v751_v38 = vmul.f32 %v749_v37, %v734_v29 }
 0xd94   :  { %v1226_v39 = vrot.slane %v751_v38, %v1972_v46  ;;  %753 = vrot.lane.b32.xlu1 %v751_v38, %s1867_s30 }
 0xd96   :  { %v1227_v40 = vcombine.high %v1226_v39, %v1226_v39  ;;  %v1234_v41 = vrot.slane %v1226_v39, %v1972_v46 }
 0xd98   :  { %v1241_v42 = vrot.slane %v1227_v40, %v1972_v46  ;;  %v1342_v43 = vrot.slane %v1234_v41, %v2003_v25 }
 0xd9a   :  { %v1346_v44 = vrot.slane %v1241_v42, %v2003_v25  ;;  %v1389_v45 = vsel %vm1388_vm10, %v1386_v60, %v1342_v43 }
 0xd9c   :  { %v1390_v47 = vsel %vm1388_vm10, %v1387_v61, %v1346_v44 }
 0xe06   :  { %v754_v48 = vpop.permute.xlu1 %753 }
 0xe07   :  { %1661 = vmatmul.mubr.msk.f32.vlgmr.msra.gmra.mxu0 %vm128_vm6, %v754_v48 }
 0xe08   :  { %1675 = vmatpush3.msra.mxu0 %v1902_v1  ;;  %1682 = vmatprep.mubr.msk.f32.mxu0 %vm1865_vm0, %v1864_v0 }
 0xe09   :  { %1676 = vmatprep.subr.mxu0 %v1864_v0 }
 0xe0a   :  { %1677 = vmatpush3.msra.mxu0 %v1911_v4 }
 0xe0b   :  { %1678 = vmatprep.subr.mxu0 %v1864_v0 }
 0xe0c   :  { %1679 = vmatpush3.msra.mxu0 %v1917_v6 }
 0xe0d   :  { %1680 = vmatprep.subr.mxu0 %v1864_v0 }
 0xe0e   :  { %1681 = vmatpush3.msra.mxu0 %v1924_v7 }
 0xec7   :  { %v823_v49 = vpop.f32.mrf.mxu0 }
 0xec8   :  { %v828_v50 = vrot.slane %v823_v49, 3  ;;  %v829_v51 = vrot.slane %v823_v49, 4 }
 0xec9   :  { %v1662_v52 = vpop.f32.mrf.mxu0 }
 0xeca   :  { %v832_v1 = vadd.f32 %v828_v50, %v1957_v12  ;;  %v833_v53 = vadd.f32 %v829_v51, %v1955_v11 }
 0xecc   :  { %v1532_v54 = vmul.f32 -1.442695, %v832_v1  ;;  %v1533_v55 = vmul.f32 -1.442695, %v833_v53 }
 0xece   :  { %1775 = vpow2.f32 %v1532_v54 }
 0xecf   :  { %1777 = vpow2.f32 %v1533_v55 }
 0xed0   :  { %1779 = vtanh.f32 %v832_v1 }
 0xed1   :  { %1781 = vtanh.f32 %v833_v53 }
 0xedb   :  { %v1776_v4 = vpop.eup %1775 }
 0xedc   :  { %v1778_v6 = vpop.eup %1777  ;;  %v842_v56 = vadd.f32 1.0, %v1776_v4 }
 0xedd   :  { %v843_v0 = vadd.f32 1.0, %v1778_v6  ;;  %v1780_v7 = vpop.eup %1779 }
 0xede   :  { %1783 = vrcp.f32 %v842_v56  ;;  %v1782_v57 = vpop.eup %1781  ;;  %v850_v59 = vrot.slane %v1780_v7, 5 }
 0xedf   :  { %1785 = vrcp.f32 %v843_v0  ;;  %v851_v60 = vrot.slane %v1782_v57, 4 }
 0xee1   :  { %v852_v2 = vsel %vm225_vm4, %v851_v60, %v850_v59 }
 0xeeb   :  { %v1784_v58 = vpop.eup %1783 }
 0xeec   :  { %v1786_v61 = vpop.eup %1785  ;;  %v856_v62 = vrot.slane %v1784_v58, 5 }
 0xeed   :  { %v857_v63 = vrot.slane %v1786_v61, 4 }
 0xeef   :  { %v858_v3 = vsel %vm225_vm4, %v857_v63, %v856_v62 }
 0xef0   :  { %v860_v5 = vsel %vm1961_vm5, %v852_v2, %v858_v3 }
 0xef1   :  { %863 = vrot.lane.b32.xlu0 %v860_v5, %s1866_s1  ;;  %v861_v10 = vmul.f32 %v860_v5, %v745_v35 }
 0xf63   :  { %v864_v8 = vpop.permute.xlu0 %863 }
 0xf64   :  { %v866_v9 = vmul.f32 %v864_v8, %v860_v5 }
 0xf66   :  { %868 = vrot.lane.b32.xlu1 %v866_v9, %s1867_s30 }
 0xfd8   :  { %v869_v13 = vpop.permute.xlu1 %868 }
 0xfd9   :  { %v871_v14 = vadd.f32 %v869_v13, %v861_v10 }
 0xfdb   :  { %1787 = vtanh.f32 %v871_v14 }
 0xfe8   :  { %v1788_v15 = vpop.eup %1787 }
 0xfe9   :  { %874 = vrot.lane.b32.xlu0 %v1788_v15, %s1866_s1 }
0x105b   :  { %v875_v16 = vpop.permute.xlu0 %874 }
0x105c   :  { %v877_v17 = vmul.f32 %v875_v16, %v860_v5 }
0x105e   :  { %v1248_v18 = vrot.slane %v877_v17, %v1972_v46  ;;  %879 = vrot.lane.b32.xlu1 %v877_v17, %s1867_s30 }
0x1060   :  { %v1249_v19 = vcombine.high %v1248_v18, %v1248_v18  ;;  %v1256_v20 = vrot.slane %v1248_v18, %v1972_v46 }
0x1062   :  { %v1263_v21 = vrot.slane %v1249_v19, %v1972_v46  ;;  %v1352_v22 = vrot.slane %v1256_v20, %v2003_v25 }
0x1064   :  { %v1356_v23 = vrot.slane %v1263_v21, %v2003_v25  ;;  %v1392_v24 = vsel %vm1391_vm11, %v1389_v45, %v1352_v22 }
0x1066   :  { %v1393_v26 = vsel %vm1391_vm11, %v1390_v47, %v1356_v23 }
0x10d0   :  { %v880_v27 = vpop.permute.xlu1 %879 }
0x10d1   :  { %1672 = vmatmul.mubr.msk.f32.vlgmr.msra.gmra.mxu1 %vm128_vm6, %v880_v27 }
0x1191   :  { %v949_v28 = vpop.f32.mrf.mxu1 }
0x1192   :  { %v954_v29 = vrot.slane %v949_v28, 2  ;;  %v955_v31 = vrot.slane %v949_v28, 3 }
0x1193   :  { %v1673_v32 = vpop.f32.mrf.mxu1 }
0x1194   :  { %v958_v33 = vadd.f32 %v954_v29, %v1957_v12  ;;  %v959_v34 = vadd.f32 %v955_v31, %v1955_v11 }
0x1196   :  { %v1535_v35 = vmul.f32 -1.442695, %v958_v33  ;;  %v1536_v36 = vmul.f32 -1.442695, %v959_v34 }
0x1198   :  { %1789 = vpow2.f32 %v1535_v35 }
0x1199   :  { %1791 = vpow2.f32 %v1536_v36  ;;  %v1403_v36 = vld [vmem:[%s2189_s2 + $0x18] sm:$0xff] }
0x119a   :  { %1793 = vtanh.f32 %v958_v33  ;;  %1685 = vmatprep.subr.mxu1 %v1403_v36 }
0x119b   :  { %1795 = vtanh.f32 %v959_v34  ;;  %1686 = vmatpush3.msra.mxu1 %v1403_v36 }
0x11a5   :  { %v1790_v37 = vpop.eup %1789 }
0x11a6   :  { %v1792_v38 = vpop.eup %1791  ;;  %v968_v39 = vadd.f32 1.0, %v1790_v37  ;;  %v1402_v37 = vld [vmem:[%s2189_s2 + $0x10] sm:$0xff] }
0x11a7   :  { %v969_v40 = vadd.f32 1.0, %v1792_v38  ;;  %v1794_v41 = vpop.eup %1793  ;;  %v1401_v38 = vld [vmem:[%s2189_s2 + $0x8] sm:$0xff]  ;;  %1687 = vmatprep.subr.mxu1 %v1402_v37 }
0x11a8   :  { %1797 = vrcp.f32 %v968_v39  ;;  %v1796_v42 = vpop.eup %1795  ;;  %v976_v44 = vrot.slane %v1794_v41, 6  ;;  %1688 = vmatpush3.msra.mxu1 %v1402_v37  ;;  %v1400_v39 = vld [vmem:[%s2189_s2] sm:$0xff] }
0x11a9   :  { %1799 = vrcp.f32 %v969_v40  ;;  %v977_v45 = vrot.slane %v1796_v42, 5  ;;  %1689 = vmatprep.subr.mxu1 %v1401_v38 }
0x11aa   :  { %1690 = vmatpush3.msra.mxu1 %v1401_v38 }
0x11ab   :  { %v978_v50 = vsel %vm225_vm4, %v977_v45, %v976_v44  ;;  %1691 = vmatprep.subr.mxu1 %v1400_v39 }
0x11ac   :  { %1692 = vmatpush3.msra.mxu1 %v1400_v39 }
0x11b5   :  { %v1798_v43 = vpop.eup %1797 }
0x11b6   :  { %v1800_v47 = vpop.eup %1799  ;;  %v982_v48 = vrot.slane %v1798_v43, 6 }
0x11b7   :  { %v983_v49 = vrot.slane %v1800_v47, 5 }
0x11b9   :  { %v984_v51 = vsel %vm225_vm4, %v983_v49, %v982_v48 }
0x11ba   :  { %v986_v52 = vsel %vm1961_vm5, %v978_v50, %v984_v51 }
0x11bb   :  { %989 = vrot.lane.b32.xlu0 %v986_v52, %s1866_s1  ;;  %v987_v54 = vmul.f32 %v986_v52, %v871_v14 }
0x122d   :  { %v990_v1 = vpop.permute.xlu0 %989 }
0x122e   :  { %v992_v53 = vmul.f32 %v990_v1, %v986_v52 }
0x1230   :  { %994 = vrot.lane.b32.xlu1 %v992_v53, %s1867_s30 }
0x12a2   :  { %v995_v55 = vpop.permute.xlu1 %994 }
0x12a3   :  { %v997_v4 = vadd.f32 %v995_v55, %v987_v54 }
0x12a5   :  { %1801 = vtanh.f32 %v997_v4 }
0x12b2   :  { %v1802_v6 = vpop.eup %1801 }
0x12b3   :  { %1000 = vrot.lane.b32.xlu0 %v1802_v6, %s1866_s1 }
0x1325   :  { %v1001_v56 = vpop.permute.xlu0 %1000 }
0x1326   :  { %v1003_v0 = vmul.f32 %v1001_v56, %v986_v52 }
0x1328   :  { %v1270_v7 = vrot.slane %v1003_v0, %v1972_v46  ;;  %1005 = vrot.lane.b32.xlu1 %v1003_v0, %s1867_s30 }
0x132a   :  { %v1271_v57 = vcombine.high %v1270_v7, %v1270_v7  ;;  %v1278_v58 = vrot.slane %v1270_v7, %v1972_v46 }
0x132c   :  { %v1285_v59 = vrot.slane %v1271_v57, %v1972_v46  ;;  %v1362_v60 = vrot.slane %v1278_v58, %v2003_v25 }
0x132e   :  { %v2140_v61 = vsel %vm1394_vm12, %v1392_v24, %v1362_v60  ;;  %v1366_v62 = vrot.slane %v1285_v59, %v2003_v25 }
0x1330   :  { %v2143_v63 = vsel %vm1394_vm12, %v1393_v26, %v1366_v62 }
0x139a   :  { %v1006_v2 = vpop.permute.xlu1 %1005 }
0x139b   :  { %1683 = vmatmul.mubr.msk.f32.vlgmr.msra.gmra.mxu0 %vm128_vm6, %v1006_v2 }
0x145b   :  { %v1075_v3 = vpop.f32.mrf.mxu0 }
0x145c   :  { %v1080_v5 = vrot.slane %v1075_v3, 1  ;;  %v1081_v8 = vrot.slane %v1075_v3, 2 }
0x145d   :  { %v1684_v9 = vpop.f32.mrf.mxu0 }
0x145e   :  { %v1084_v10 = vadd.f32 %v1080_v5, %v1957_v12  ;;  %v1085_v13 = vadd.f32 %v1081_v8, %v1955_v11 }
0x1460   :  { %v1538_v14 = vmul.f32 -1.442695, %v1084_v10  ;;  %v1539_v15 = vmul.f32 -1.442695, %v1085_v13 }
0x1462   :  { %1803 = vpow2.f32 %v1538_v14 }
0x1463   :  { %1805 = vpow2.f32 %v1539_v15 }
0x1464   :  { %1807 = vtanh.f32 %v1084_v10 }
0x1465   :  { %1809 = vtanh.f32 %v1085_v13 }
0x146f   :  { %v1804_v16 = vpop.eup %1803 }
0x1470   :  { %v1806_v17 = vpop.eup %1805  ;;  %v1094_v18 = vadd.f32 1.0, %v1804_v16 }
0x1471   :  { %v1095_v19 = vadd.f32 1.0, %v1806_v17  ;;  %v1808_v20 = vpop.eup %1807 }
0x1472   :  { %1811 = vrcp.f32 %v1094_v18  ;;  %v1810_v21 = vpop.eup %1809  ;;  %v1102_v23 = vrot.slane %v1808_v20, 7 }
0x1473   :  { %1813 = vrcp.f32 %v1095_v19  ;;  %v1103_v24 = vrot.slane %v1810_v21, 6 }
0x1475   :  { %v1104_v27 = vsel %vm225_vm4, %v1103_v24, %v1102_v23 }
0x147f   :  { %v1812_v22 = vpop.eup %1811 }
0x1480   :  { %v1814_v12 = vpop.eup %1813  ;;  %v1108_v26 = vrot.slane %v1812_v22, 7 }
0x1481   :  { %v1109_v11 = vrot.slane %v1814_v12, 6 }
0x1483   :  { %v1110_v28 = vsel %vm225_vm4, %v1109_v11, %v1108_v26 }
0x1484   :  { %v1112_v29 = vsel %vm1961_vm5, %v1104_v27, %v1110_v28 }
0x1485   :  { %1115 = vrot.lane.b32.xlu0 %v1112_v29, %s1866_s1  ;;  %v1113_v33 = vmul.f32 %v1112_v29, %v997_v4 }
0x14f7   :  { %v1116_v31 = vpop.permute.xlu0 %1115 }
0x14f8   :  { %v1118_v32 = vmul.f32 %v1116_v31, %v1112_v29 }
0x14fa   :  { %1120 = vrot.lane.b32.xlu1 %v1118_v32, %s1867_s30 }
0x156c   :  { %v1121_v34 = vpop.permute.xlu1 %1120 }
0x156d   :  { %v1123_v35 = vadd.f32 %v1121_v34, %v1113_v33 }
0x156f   :  { %1815 = vtanh.f32 %v1123_v35 }
0x157c   :  { %v1816_v30 = vpop.eup %1815 }
0x157d   :  { %1126 = vrot.lane.b32.xlu0 %v1816_v30, %s1866_s1 }
0x15ef   :  { %v1127_v40 = vpop.permute.xlu0 %1126 }
0x15f0   :  { %v1129_v41 = vmul.f32 %v1127_v40, %v1112_v29 }
0x15f2   :  { %v1293_v42 = vrot.slane %v1129_v41, %v1972_v46 }
0x15f4   :  { %v1294_v43 = vcombine.high %v1293_v42, %v1293_v42  ;;  %v1301_v44 = vrot.slane %v1293_v42, %v1972_v46 }
0x15f6   :  { %v1308_v45 = vrot.slane %v1294_v43, %v1972_v46  ;;  %v1372_v47 = vrot.slane %v1301_v44, %v2003_v25  ;;  %v1540_v46 = vld [vmem:[%s2189_s2 + $0x20] ss:$0 sm:$0xff] }
0x15f8   :  { %v1398_v48 = vsel %vm1397_vm13, %v2140_v61, %v1372_v47  ;;  %v1376_v49 = vrot.slane %v1308_v45, %v2003_v25 }
0x15f9   :  { %1411 = vrot.lane.b32.xlu1 %v1398_v48, %s1867_s30 }
0x15fa   :  { %v1399_v50 = vsel %vm1397_vm13, %v2143_v63, %v1376_v49 }
0x15fb   :  { %1413 = vrot.lane.b32.xlu0 %v1399_v50, %s1867_s30 }
0x166b   :  { %v1412_v51 = vpop.permute.xlu1 %1411 }
0x166c   :  { %1693 = vmatprep.mubr.msk.f32.mxu1 %vm128_vm6, %v1412_v51 }
0x166d   :  { %v1414_v52 = vpop.permute.xlu0 %1413 }
0x166e   :  { %1694 = vmatmul.mubr.msk.f32.vlgmr.msra.gmra.mxu1 %vm128_vm6, %v1414_v52 }
0x172e   :  { %v1695_v1 = vpop.f32.mrf.mxu1 }
0x172f   :  { %v1491_v25 = vadd.f32 %v1695_v1, %v1540_v46 }
0x1730   :  { %v1485_v53 = vpop.f32.mrf.mxu1 }
0x1731   :  { %v1486_v54 = vadd.f32 %v1540_v46, %v1485_v53  ;;  %1496 = vst.msk [vmem:[#allocation5 + $0x8] sm:$0xff] %vm1494_vm14, %v1491_v25 }
0x1733   :  { %1495 = vst.msk [vmem:[#allocation5] sm:$0xff] %vm1494_vm14, %v1486_v54 }
0x1734   :  { %1848 = shalt.err (!%p1845_p9)
}
0x1735   :  { %1508 = dma.vmem_to_hbm [thread:$0]  %s1503_s17, 256, %s2190_s3, [#allocation4], %s1862_s15, %s1862_s15, %s1863_s16  }
0x1736   :  { %1859 = dma.done.wait [#allocation4], 256  }
0x1737   :  { %1860 = vsyncadd [#allocation4], 4294967040 }
0x1738   :  { %1512 = vsyncpa [#allocation3], 1 }
0x1739   :  { %1513 = vsyncpa [#allocation4], 1 }

</bundles_post_ra>
